<compile_context>
chip_gen: v7x
topology: tpu7x:2x2x1
jax: 0.10.0
libtpu: 0.0.40
codegen_flags: <defaults>
</compile_context>

<pallas_src>
import functools
import math

import jax
import jax.numpy as jnp
from jax.experimental import pallas as pl
from jax.experimental.pallas import tpu as pltpu


def _resolve_params(loss_type, s, m):
    loss_type = loss_type.lower()
    if loss_type == 'arcface':
        s = 64.0 if not s else s
        m = 0.5 if not m else m
    elif loss_type == 'cosface':
        s = 30.0 if not s else s
        m = 0.4 if not m else m
    else:
        # TODO(synk): 'sphereface' (cos(m*acos(t)) with non-integer m) and plain
        # 'crossentropy' are not implemented in the Pallas path.
        raise NotImplementedError(loss_type)
    return loss_type, float(s), float(m)


def _round_up(x, n):
    return (x + n - 1) // n * n


def _divisor_tile(n, target, q):
    """Largest multiple of `q` that divides `n` and is <= min(target, n).
    Requires n % q == 0 (so `q` itself is always a valid answer)."""
    t = min(int(target), n)
    t -= t % q
    t = max(t, q)
    while n % t != 0:
        t -= q
    return t


def _batch_tile(B, target):
    """Batch tile: exact divisor of B, multiple of 8, capped so there are >= 2
    batch tiles when possible (keeps both v7x TensorCores busy on the 'parallel'
    batch axis)."""
    if B % 8 != 0:
        return B                        # full-height block (legal for any B)
    cap = target if B <= 8 else min(int(target), max(8, (B // 2) - (B // 2) % 8))
    return _divisor_tile(B, cap, 8)


def _class_tiling(C, target, bytes_per_col, budget=24 << 20):
    """Class tiling -> (ct, C_work, mask_cols).

    * C % 128 == 0            : exact-divisor tile (no padding, no masking).
    * ragged C, fits one tile : single full-width class tile (no padding copy).
    * otherwise               : pad class dim to a 128-multiple (only copying path)
                                and mask the padded columns in-kernel."""
    if C % 128 == 0:
        return _divisor_tile(C, target, 128), C, False
    if C <= 2 * int(target) and C * bytes_per_col <= budget:
        return C, C, False
    C_pad = _round_up(C, 128)
    return _divisor_tile(C_pad, target, 128), C_pad, True


def _accumulate_and_finalize(wf, labels_ref, out_ref, sum_scr, tgt_scr, *,
                             s, m, eps, loss_type, num_classes, ct, mask_cols):
    """Accumulate one (bt, ct) f32 cosine tile into per-row softmax state and
    write the per-row loss on the last class tile."""
    c_idx = pl.program_id(1)

    @pl.when(c_idx == 0)
    def _():
        sum_scr[...] = jnp.zeros_like(sum_scr)
        tgt_scr[...] = jnp.zeros_like(tgt_scr)

    labels = labels_ref[...]                                   # (bt, 1) int32
    lane = jax.lax.broadcasted_iota(jnp.int32, wf.shape, 1)
    is_target = lane == (labels - c_idx * ct)                  # (bt, ct) bool

    if mask_cols:  # static: only emitted on the padded-class fallback path
        wf = jnp.where(lane < (num_classes - c_idx * ct), wf, -2.0)

    # Target-cosine gather: exactly one hit per row across all class tiles.
    tgt_scr[...] += jnp.sum(jnp.where(is_target, wf, 0.0), axis=1, keepdims=True)

    # Statically rescaled softmax sum: wf is a cosine, so s*wf - s <= ~0 and exp
    # never overflows -> no online running max.  The target column is excluded
    # *before* the sum: subtracting exp(s*(t-1)) at finalize would cancel
    # catastrophically when the target term dominates the accumulated sum.
    zexp = jnp.exp(s * wf - s)
    sum_scr[...] += jnp.sum(jnp.where(is_target, 0.0, zexp), axis=1, keepdims=True)

    @pl.when(c_idx == pl.num_programs(1) - 1)
    def _():
        t = tgt_scr[...]
        if loss_type == 'cosface':
            numerator = s * (t - m)
        else:  # arcface: s*cos(acos(t)+m) == s*(t*cos(m) - sqrt(1-t^2)*sin(m))
            tc = jnp.clip(t, -1.0 + eps, 1.0 - eps)
            sin_t = jnp.sqrt(jnp.maximum(1.0 - tc * tc, 0.0))
            numerator = s * (tc * math.cos(m) - sin_t * math.sin(m))
        # denominator = exp(numerator) + exp(s)*sum_scr, evaluated as a stable
        # two-term log-sum-exp (sum_scr == 0 gives log_excl = -inf -> handled).
        log_excl = s + jnp.log(sum_scr[...])
        mx = jnp.maximum(numerator, log_excl)
        log_den = mx + jnp.log(jnp.exp(numerator - mx) + jnp.exp(log_excl - mx))
        out_ref[...] = numerator - log_den                      # (bt, 1)


def _ap_loss_kernel(labels_ref, wf_ref, out_ref, sum_scr, tgt_scr, *,
                    s, m, eps, loss_type, num_classes, ct, mask_cols):
    wf = wf_ref[...].astype(jnp.float32)   # native-dtype HBM load, f32 compute
    _accumulate_and_finalize(wf, labels_ref, out_ref, sum_scr, tgt_scr,
                             s=s, m=m, eps=eps, loss_type=loss_type,
                             num_classes=num_classes, ct=ct, mask_cols=mask_cols)


def _ap_loss_fused_kernel(labels_ref, emb_ref, wt_ref, out_ref, sum_scr, tgt_scr, *,
                          s, m, eps, loss_type, num_classes, ct, mask_cols):
    # (bt, D) @ (D, ct) on the MXU; the (B, C) cosine matrix never touches HBM.
    wf = jnp.dot(emb_ref[...], wt_ref[...], preferred_element_type=jnp.float32)
    _accumulate_and_finalize(wf, labels_ref, out_ref, sum_scr, tgt_scr,
                             s=s, m=m, eps=eps, loss_type=loss_type,
                             num_classes=num_classes, ct=ct, mask_cols=mask_cols)


def _pallas_loss_call(kernel, inputs, in_specs, B, bt, grid, in_tile_bytes):
    # VMEM cap: double-buffered input tiles + resident output/scratch + headroom,
    # floored at 32 MiB and kept well under v7x's 64 MiB for the default tiles.
    vmem_limit = max(32 << 20, min(2 * int(in_tile_bytes) + (16 << 20), 96 << 20))
    per_row = pl.pallas_call(
        kernel,
        out_shape=jax.ShapeDtypeStruct((B, 1), jnp.float32),
        grid_spec=pltpu.PrefetchScalarGridSpec(
            num_scalar_prefetch=0,
            grid=grid,                                  # (batch tiles, class tiles)
            in_specs=in_specs,
            out_specs=pl.BlockSpec((bt, 1), lambda b, c: (b, 0)),
            scratch_shapes=[pltpu.VMEM((bt, 1), jnp.float32)] * 2),
        compiler_params=pltpu.CompilerParams(
            dimension_semantics=("parallel", "arbitrary"),
            vmem_limit_bytes=vmem_limit),
    )(*inputs)
    return -jnp.mean(per_row)


def angular_penalty_sm_loss(wf, labels, loss_type='arcface', eps=1e-7,
                            s=None, m=None, b_tile=512, c_tile=4096):
    """Pallas forward of AngularPenaltySMLoss.  wf: (B, C) cosine logits (any float
    dtype; cast to f32 in-kernel), labels: (B,) int class ids.  Returns scalar loss."""
    loss_type, s, m = _resolve_params(loss_type, s, m)
    B, C = wf.shape
    bt = _batch_tile(B, b_tile)
    itemsize = jnp.dtype(wf.dtype).itemsize
    ct, C_work, mask_cols = _class_tiling(C, c_tile, 2 * bt * itemsize)
    if C_work != C:
        # Rare fallback: ragged class dim too large for one tile -> pad to 128x.
        wf = jnp.pad(wf, ((0, 0), (0, C_work - C)))
    labels2 = labels.reshape(B, 1).astype(jnp.int32)
    kernel = functools.partial(_ap_loss_kernel, s=s, m=m, eps=float(eps),
                               loss_type=loss_type, num_classes=C, ct=ct,
                               mask_cols=mask_cols)
    in_specs = [pl.BlockSpec((bt, 1), lambda b, c: (b, 0)),
                pl.BlockSpec((bt, ct), lambda b, c: (b, c))]
    in_tile_bytes = bt * ct * itemsize + bt * 4
    return _pallas_loss_call(kernel, (labels2, wf), in_specs, B, bt,
                             (B // bt, C_work // ct), in_tile_bytes)


def angular_penalty_sm_loss_fused(emb, w, labels, loss_type='arcface', eps=1e-7,
                                  s=None, m=None, b_tile=512, c_tile=4096,
                                  mxu_dtype=jnp.bfloat16):
    """Fused variant: emb (B, D) L2-normalized features, w (C, D) L2-normalized
    class weights.  wf = emb @ w.T is computed tile-by-tile on the MXU inside the
    kernel; operands default to bf16 for native MXU throughput."""
    loss_type, s, m = _resolve_params(loss_type, s, m)
    B, D = emb.shape
    C, D2 = w.shape
    assert D == D2
    if mxu_dtype is not None:
        emb = emb.astype(mxu_dtype)
        w = w.astype(mxu_dtype)
    bt = _batch_tile(B, b_tile)
    itemsize = jnp.dtype(emb.dtype).itemsize
    ct, C_work, mask_cols = _class_tiling(C, c_tile, 2 * D * itemsize + 4 * bt)
    w_t = w.T                                  # one-time (D, C) relayout for the MXU
    if C_work != C:
        w_t = jnp.pad(w_t, ((0, 0), (0, C_work - C)))   # cheap: (D, C) only
    labels2 = labels.reshape(B, 1).astype(jnp.int32)
    kernel = functools.partial(_ap_loss_fused_kernel, s=s, m=m, eps=float(eps),
                               loss_type=loss_type, num_classes=C, ct=ct,
                               mask_cols=mask_cols)
    in_specs = [pl.BlockSpec((bt, 1), lambda b, c: (b, 0)),
                pl.BlockSpec((bt, D), lambda b, c: (b, 0)),
                pl.BlockSpec((D, ct), lambda b, c: (0, c))]
    in_tile_bytes = bt * D * itemsize + D * ct * itemsize + bt * ct * 4 + bt * 4
    return _pallas_loss_call(kernel, (labels2, emb, w_t), in_specs, B, bt,
                             (B // bt, C_work // ct), in_tile_bytes)


def _reference_loss(wf, labels, loss_type='arcface', eps=1e-7, s=None, m=None):
    """Pure-JAX transcription of the PyTorch forward (sanity check)."""
    loss_type, s, m = _resolve_params(loss_type, s, m)
    B, C = wf.shape
    target = wf[jnp.arange(B), labels]
    if loss_type == 'arcface':
        numerator = s * jnp.cos(
            jnp.arccos(jnp.clip(target, -1.0 + eps, 1.0 - eps)) + m)
    else:  # cosface
        numerator = s * (target - m)
    onehot = jax.nn.one_hot(labels, C, dtype=bool)
    excl_sum = jnp.sum(jnp.where(onehot, 0.0, jnp.exp(s * wf)), axis=1)
    denominator = jnp.exp(numerator) + excl_sum
    return -jnp.mean(numerator - jnp.log(denominator))


if __name__ == "__main__":
    key = jax.random.PRNGKey(0)
    B, C, D = 16, 300, 64   # C not a multiple of 128 -> exercises the ragged path

    k_emb, k_w, k_lab = jax.random.split(key, 3)
    emb = jax.random.normal(k_emb, (B, D), dtype=jnp.float32)
    w = jax.random.normal(k_w, (C, D), dtype=jnp.float32)
    emb_n = emb / jnp.linalg.norm(emb, axis=1, keepdims=True)
    w_n = w / jnp.linalg.norm(w, axis=1, keepdims=True)
    wf = emb_n @ w_n.T                                  # (B, C) cosines in [-1, 1]
    labels = jax.random.randint(k_lab, (B,), 0, C, dtype=jnp.int32)

    for lt in ("arcface", "cosface"):
        ref = jax.block_until_ready(_reference_loss(wf, labels, loss_type=lt))

        # (1) Default tiles: ragged C handled as one full-width class tile, zero
        #     padding copies; batch tile auto-capped to give 2 "parallel" tiles.
        got = jax.block_until_ready(
            angular_penalty_sm_loss(wf, labels, loss_type=lt))
        assert jnp.allclose(got, ref, rtol=2e-3, atol=2e-3), (lt, got, ref)

        # (2) bf16 wf + small class tile: native-dtype load, padded-class fallback,
        #     multi-tile class accumulation with in-kernel column masking.
        wf16 = wf.astype(jnp.bfloat16)
        ref16 = jax.block_until_ready(
            _reference_loss(wf16.astype(jnp.float32), labels, loss_type=lt))
        got16 = jax.block_until_ready(
            angular_penalty_sm_loss(wf16, labels, loss_type=lt, c_tile=128))
        assert jnp.allclose(got16, ref16, rtol=2e-3, atol=2e-3), (lt, got16, ref16)

        # (3) C a multiple of 128: exact-divisor class tiling, no padding, no mask.
        wf384 = jnp.concatenate([wf, wf[:, :84]], axis=1)       # (B, 384)
        ref384 = jax.block_until_ready(_reference_loss(wf384, labels, loss_type=lt))
        got384 = jax.block_until_ready(
            angular_penalty_sm_loss(wf384, labels, loss_type=lt, c_tile=128))
        assert jnp.allclose(got384, ref384, rtol=2e-3, atol=2e-3), (lt, got384, ref384)

        # (4) Fused (bf16 MXU), single class tile: cosines never materialized in HBM.
        fused = jax.block_until_ready(
            angular_penalty_sm_loss_fused(emb_n, w_n, labels, loss_type=lt))
        assert jnp.allclose(fused, ref, rtol=5e-2, atol=0.25), (lt, fused, ref)

        # (5) Fused (bf16 MXU), small class tile: padded/masked multi-tile path.
        fused2 = jax.block_until_ready(
            angular_penalty_sm_loss_fused(emb_n, w_n, labels, loss_type=lt,
                                          c_tile=128))
        assert jnp.allclose(fused2, ref, rtol=5e-2, atol=0.25), (lt, fused2, ref)

    print("KERNEL_OK")
</pallas_src>

<mosaic_0001>
module attributes {stable_mosaic.version = 11 : i64} {
  func.func @_ap_loss_kernel(%arg0: i32, %arg1: i32, %arg2: memref<8x1xi32, #tpu.memory_space<vmem>>, %arg3: memref<8x300xf32, #tpu.memory_space<vmem>>, %arg4: memref<8x1xf32, #tpu.memory_space<vmem>>, %arg5: memref<8x1xf32, #tpu.memory_space<vmem>>, %arg6: memref<8x1xf32, #tpu.memory_space<vmem>>) attributes {dimension_semantics = [#tpu.dimension_semantics<parallel>, #tpu.dimension_semantics<arbitrary>], iteration_bounds = array<i64: 2, 1>, scalar_prefetch = 0 : i64, scratch_operands = 2 : i64, tpu.core_type = #tpu.core_type<tc>, window_params = [{transform_indices = @transform_0, window_bounds = array<i64: 8, 1>}, {transform_indices = @transform_1, window_bounds = array<i64: 8, 300>}, {transform_indices = @transform_2, window_bounds = array<i64: 8, 1>}]} {
    %c0 = arith.constant 0 : index
    %c0_0 = arith.constant 0 : index
    %0 = vector.load %arg3[%c0, %c0_0] : memref<8x300xf32, #tpu.memory_space<vmem>>, vector<8x300xf32>
    %c0_i32 = arith.constant 0 : i32
    %1 = arith.cmpi eq, %arg1, %c0_i32 : i32
    %2 = arith.extui %1 : i1 to i32
    %c0_i32_1 = arith.constant 0 : i32
    %3 = arith.cmpi ne, %2, %c0_i32_1 : i32
    scf.if %3 {
      %cst_19 = arith.constant 0.000000e+00 : f32
      %33 = vector.broadcast %cst_19 : f32 to vector<8x1xf32>
      %c0_20 = arith.constant 0 : index
      %c0_21 = arith.constant 0 : index
      %34 = vector.load %arg5[%c0_20, %c0_21] : memref<8x1xf32, #tpu.memory_space<vmem>>, vector<8x1xf32>
      tpu.vector_store %arg5[%c0_20, %c0_21], %33 {strides = array<i32>} : memref<8x1xf32, #tpu.memory_space<vmem>>, vector<8x1xf32>,
      %cst_22 = arith.constant 0.000000e+00 : f32
      %35 = vector.broadcast %cst_22 : f32 to vector<8x1xf32>
      %c0_23 = arith.constant 0 : index
      %c0_24 = arith.constant 0 : index
      %36 = vector.load %arg6[%c0_23, %c0_24] : memref<8x1xf32, #tpu.memory_space<vmem>>, vector<8x1xf32>
      tpu.vector_store %arg6[%c0_23, %c0_24], %35 {strides = array<i32>} : memref<8x1xf32, #tpu.memory_space<vmem>>, vector<8x1xf32>,
    } else {
    }
    %c0_2 = arith.constant 0 : index
    %c0_3 = arith.constant 0 : index
    %4 = vector.load %arg2[%c0_2, %c0_3] : memref<8x1xi32, #tpu.memory_space<vmem>>, vector<8x1xi32>
    %5 = tpu.iota {dimensions = array<i32: 1>} : vector<8x300xi32>
    %c300_i32 = arith.constant 300 : i32
    %6 = arith.muli %arg1, %c300_i32 : i32
    %7 = vector.broadcast %6 : i32 to vector<8x1xi32>
    %8 = arith.subi %4, %7 : vector<8x1xi32>
    %9 = vector.broadcast %8 : vector<8x1xi32> to vector<8x300xi32>
    %10 = arith.cmpi eq, %5, %9 : vector<8x300xi32>
    %c0_4 = arith.constant 0 : index
    %c0_5 = arith.constant 0 : index
    %11 = vector.load %arg6[%c0_4, %c0_5] : memref<8x1xf32, #tpu.memory_space<vmem>>, vector<8x1xf32>
    %cst = arith.constant 0.000000e+00 : f32
    %12 = vector.broadcast %cst : f32 to vector<8x300xf32>
    %13 = arith.select %10, %0, %12 : vector<8x300xi1>, vector<8x300xf32>
    %cst_6 = arith.constant dense<0.000000e+00> : vector<8xf32>
    %14 = vector.multi_reduction <add>, %13, %cst_6 [1] : vector<8x300xf32> to vector<8xf32>
    %15 = vector.shape_cast %14 : vector<8xf32> to vector<8x1xf32>
    %16 = arith.addf %11, %15 : vector<8x1xf32>
    %c0_7 = arith.constant 0 : index
    %c0_8 = arith.constant 0 : index
    %17 = vector.load %arg6[%c0_7, %c0_8] : memref<8x1xf32, #tpu.memory_space<vmem>>, vector<8x1xf32>
    tpu.vector_store %arg6[%c0_7, %c0_8], %16 {strides = array<i32>} : memref<8x1xf32, #tpu.memory_space<vmem>>, vector<8x1xf32>,
    %cst_9 = arith.constant 6.400000e+01 : f32
    %18 = vector.broadcast %cst_9 : f32 to vector<8x300xf32>
    %19 = arith.mulf %18, %0 : vector<8x300xf32>
    %cst_10 = arith.constant 6.400000e+01 : f32
    %20 = vector.broadcast %cst_10 : f32 to vector<8x300xf32>
    %21 = arith.subf %19, %20 : vector<8x300xf32>
    %22 = math.exp %21 : vector<8x300xf32>
    %c0_11 = arith.constant 0 : index
    %c0_12 = arith.constant 0 : index
    %23 = vector.load %arg5[%c0_11, %c0_12] : memref<8x1xf32, #tpu.memory_space<vmem>>, vector<8x1xf32>
    %cst_13 = arith.constant 0.000000e+00 : f32
    %24 = vector.broadcast %cst_13 : f32 to vector<8x300xf32>
    %25 = arith.select %10, %24, %22 : vector<8x300xi1>, vector<8x300xf32>
    %cst_14 = arith.constant dense<0.000000e+00> : vector<8xf32>
    %26 = vector.multi_reduction <add>, %25, %cst_14 [1] : vector<8x300xf32> to vector<8xf32>
    %27 = vector.shape_cast %26 : vector<8xf32> to vector<8x1xf32>
    %28 = arith.addf %23, %27 : vector<8x1xf32>
    %c0_15 = arith.constant 0 : index
    %c0_16 = arith.constant 0 : index
    %29 = vector.load %arg5[%c0_15, %c0_16] : memref<8x1xf32, #tpu.memory_space<vmem>>, vector<8x1xf32>
    tpu.vector_store %arg5[%c0_15, %c0_16], %28 {strides = array<i32>} : memref<8x1xf32, #tpu.memory_space<vmem>>, vector<8x1xf32>,
    %c0_i32_17 = arith.constant 0 : i32
    %30 = arith.cmpi eq, %arg1, %c0_i32_17 : i32
    %31 = arith.extui %30 : i1 to i32
    %c0_i32_18 = arith.constant 0 : i32
    %32 = arith.cmpi ne, %31, %c0_i32_18 : i32
    scf.if %32 {
      %c0_19 = arith.constant 0 : index
      %c0_20 = arith.constant 0 : index
      %33 = vector.load %arg6[%c0_19, %c0_20] : memref<8x1xf32, #tpu.memory_space<vmem>>, vector<8x1xf32>
      %cst_21 = arith.constant -0.99999988 : f32
      %cst_22 = arith.constant 0.99999988 : f32
      %34 = vector.broadcast %cst_21 : f32 to vector<8x1xf32>
      %35 = arith.maximumf %34, %33 : vector<8x1xf32>
      %36 = vector.broadcast %cst_22 : f32 to vector<8x1xf32>
      %37 = arith.minimumf %36, %35 : vector<8x1xf32>
      %38 = arith.mulf %37, %37 : vector<8x1xf32>
      %cst_23 = arith.constant 1.000000e+00 : f32
      %39 = vector.broadcast %cst_23 : f32 to vector<8x1xf32>
      %40 = arith.subf %39, %38 : vector<8x1xf32>
      %cst_24 = arith.constant 0.000000e+00 : f32
      %41 = vector.broadcast %cst_24 : f32 to vector<8x1xf32>
      %42 = arith.maximumf %40, %41 : vector<8x1xf32>
      %43 = math.sqrt %42 : vector<8x1xf32>
      %cst_25 = arith.constant 0.87758255 : f32
      %44 = vector.broadcast %cst_25 : f32 to vector<8x1xf32>
      %45 = arith.mulf %37, %44 : vector<8x1xf32>
      %cst_26 = arith.constant 0.47942555 : f32
      %46 = vector.broadcast %cst_26 : f32 to vector<8x1xf32>
      %47 = arith.mulf %43, %46 : vector<8x1xf32>
      %48 = arith.subf %45, %47 : vector<8x1xf32>
      %cst_27 = arith.constant 6.400000e+01 : f32
      %49 = vector.broadcast %cst_27 : f32 to vector<8x1xf32>
      %50 = arith.mulf %49, %48 : vector<8x1xf32>
      %c0_28 = arith.constant 0 : index
      %c0_29 = arith.constant 0 : index
      %51 = vector.load %arg5[%c0_28, %c0_29] : memref<8x1xf32, #tpu.memory_space<vmem>>, vector<8x1xf32>
      %52 = math.log %51 : vector<8x1xf32>
      %cst_30 = arith.constant 6.400000e+01 : f32
      %53 = vector.broadcast %cst_30 : f32 to vector<8x1xf32>
      %54 = arith.addf %53, %52 : vector<8x1xf32>
      %55 = arith.maximumf %50, %54 : vector<8x1xf32>
      %56 = arith.subf %50, %55 : vector<8x1xf32>
      %57 = math.exp %56 : vector<8x1xf32>
      %58 = arith.subf %54, %55 : vector<8x1xf32>
      %59 = math.exp %58 : vector<8x1xf32>
      %60 = arith.addf %57, %59 : vector<8x1xf32>
      %61 = math.log %60 : vector<8x1xf32>
      %62 = arith.addf %55, %61 : vector<8x1xf32>
      %63 = arith.subf %50, %62 : vector<8x1xf32>
      %c0_31 = arith.constant 0 : index
      %c0_32 = arith.constant 0 : index
      %64 = vector.load %arg4[%c0_31, %c0_32] : memref<8x1xf32, #tpu.memory_space<vmem>>, vector<8x1xf32>
      tpu.vector_store %arg4[%c0_31, %c0_32], %63 {strides = array<i32>} : memref<8x1xf32, #tpu.memory_space<vmem>>, vector<8x1xf32>,
    } else {
    }
    return
  }
  func.func @transform_0(%arg0: i32, %arg1: i32) -> (i32, i32) {
    %c0_i32 = arith.constant 0 : i32
    %c0_i32_0 = arith.constant 0 : i32
    return %arg0, %c0_i32 : i32, i32
  }
  func.func @transform_1(%arg0: i32, %arg1: i32) -> (i32, i32) {
    %c0_i32 = arith.constant 0 : i32
    return %arg0, %arg1 : i32, i32
  }
  func.func @transform_2(%arg0: i32, %arg1: i32) -> (i32, i32) {
    %c0_i32 = arith.constant 0 : i32
    %c0_i32_0 = arith.constant 0 : i32
    return %arg0, %c0_i32 : i32, i32
  }
}

</mosaic_0001>

<bundles_post_ra>
// kernel: tpu_custom_call.1
= control target key start
LH: loop header
LB: loop body
LE: loop exit
PB: predicated region body
PF: predicated region fallthrough
CT: control target
= control target key end

     0   :  { %7 = vsyncpa [#allocation5], 0  ;;  %s704_s0 = inlined_call_operand.vmem [shape: s32[16,1], index: 0, kind: input, shape index: {}]   ;;  %s705_s1 = inlined_call_operand.hbm [shape: f32[16,300], index: 1, kind: input, shape index: {}]   ;;  %s706_s2 = inlined_call_operand.vmem [shape: f32[16,1], index: 2, kind: output, shape index: {}]  }
   0x1   :  { %9 = vsyncpa [#allocation5 + $0x1], 0  ;;  %s570_s9 = smov 0   ;;  %s572_s10 = smov 0  }
   0x2   :  { %s574_s11 = smov 0   ;;  %s576_s12 = smov 0  }
   0x3   :  { %s578_s13 = smov 0   ;;  %s580_s14 = smov 0  }
   0x4 LB: > { %s379_s15 = sadd.s32 4294967295, %s550_s14   ;;  %s27_s16 = sadd.s32 1, %s546_s13  ;;  %s550_s14 = sphi %s580_s14, %s15_s14   ;;  %s546_s13 = sphi %s578_s13, %s715_s13   ;;  %s542_s12 = sphi %s576_s12, %s714_s12   ;;  %s538_s11 = sphi %s574_s11, %s713_s11   ;;  %s534_s10 = sphi %s572_s10, %s712_s10   ;;  %s530_s9 = sphi %s570_s9, %s711_s9  }
   0x5   : > { %p29_p0 = scmp.ge.s32.totalorder %s27_s16, 2  ;;  %s62_s17 = sadd.s32 1, %s538_s11 }
   0x6   : > { %p69_p1 = scmp.ne.s32.totalorder %s538_s11, %s534_s10  ;;  %p70_p2 = scmp.eq.s32.totalorder %s550_s14, 0 }
   0x7   : > { %s717_s16 = smov (%p29_p0, %s27_s16), 0  ;;  %p75_p4 = scmp.ne.s32.totalorder %s534_s10, %s530_s9 }
   0x8   : > { %p71_p3 = por %p70_p2, %p69_p1  ;;  %s57_s18 = ssub.s32 %s546_s13, %s717_s16 }
   0x9   : > { %p76_p5 = scmp.eq.s32.totalorder %s379_s15, 0  ;;  %p60_p6 = scmp.eq.s32.totalorder %s57_s18, 0 }
   0xa   : > { %p402_p8 = scmp.lt.s32.totalorder %s550_s14, 2  ;;  %s132_s21 = sand.u32 1, %s538_s11  }
   0xb   : > { %p609_p7 = por %p76_p5, %p75_p4  ;;  %s394_s22 = smul.u32 384, %s546_s13 }
   0xc   : > { %s615_s20 = scalar_select %p60_p6, %s538_s11, %s62_s17  }
   0xd   : > { %s393_s23 = smul.u32 24, %s132_s21  ;;  %s622_s26 = scalar_lea.hbm %s705_s1, %s394_s22 }
   0xe   : > { %p624_p9 = pnand %p402_p8, %p71_p3  ;;  %s133_s30 = scalar_lea.sflag [#allocation5], %s132_s21 }
   0xf   : > { %s136_s28 = scalar_lea.vmem [#allocation4], %s393_s23  ;;  %s470_s3 = scalar_lea.hbm %s622_s26, 384 }
  0x10   : > { %s146_s29 = sshll.u32 %s136_s28, 4  ;;  %p471_p12 = scmp.ne.s32.totalorder %s622_s26, %s470_s3  ;;  %s629_s29 = int_to_ptr.vmem [resolvable:$true] %s146_s29 }
  0x11   : > { %p472_p13 = pneg %p624_p9  ;;  %s475_s6 = scalar_lea.hbm %s705_s1, 768 }
  0x12   : > { %p476_p2 = scmp.lt.u32.totalorder %s622_s26, %s705_s1  ;;  %p477_p3 = scmp.lt.u32.totalorder %s475_s6, %s470_s3 }
  0x13   : > { %p473_p0 = pnand %p472_p13, %p471_p12  ;;  %p479_p5 = scmp.lt.u32.totalorder %s470_s3, %s622_s26 }
  0x14   : > { %p478_p4 = por %p477_p3, %p476_p2 }
  0x15   : > { %p474_p1 = pneg %p473_p0 }
  0x16   : > { %p480_p6 = por %p479_p5, %p478_p4 }
  0x18   : > { %p481_p8 = pnand %p480_p6, %p474_p1 }
  0x1a   : > { %484 = shalt.err (!%p481_p8)
}
  0x1b   : > { %s485_s9 = scalar_lea.vmem %s629_s29, 384  ;;  %s552_s15 = smov [#allocation4]  }
  0x1c   : > { %p486_p12 = scmp.ne.s32.totalorder %s629_s29, %s485_s9  ;;  %s490_s17 = sshll.u32 %s552_s15, 4  ;;  %s491_s17 = int_to_ptr.vmem [resolvable:$false] %s490_s17 }
  0x1d   : > { %s492_s18 = scalar_lea.vmem %s491_s17, 768  ;;  %p493_p11 = scmp.lt.s32.totalorder %s629_s29, %s491_s17 }
  0x1e   : > { %p488_p0 = pnand %p486_p12, %p472_p13  ;;  %p494_p2 = scmp.lt.s32.totalorder %s492_s18, %s485_s9 }
  0x20   : > { %p489_p10 = pneg %p488_p0  ;;  %p495_p3 = por %p494_p2, %p493_p11 }
  0x22   : > { %p496_p4 = pnand %p495_p3, %p489_p10 }
  0x24   : > { %499 = shalt.err (!%p496_p4)
}
  0x25   : > { %401 = dma.hbm_to_vmem [thread:$0]  (!%p624_p9), %s622_s26, 384, %s629_s29, %s133_s30  }
  0x26   : > { %p709_p1 = scmp.lt.s32.totalorder %s550_s14, 3  ;;  %p710_p5 = scmp.ge.s32.totalorder %s550_s14, 1 }
  0x28   : > { %p152_p13 = pnand %p710_p5, %p709_p1 }
  0x29   : > { %s157_s21 = sand.u32 (!%p152_p13), 1, %s534_s10  }
  0x2a   : > { %155 = sbr.rel (%p152_p13) target bundleno = 410 (0x19a), region = 28  ;;  %s158_s23 = scalar_lea.sflag (!%p152_p13), [#allocation5], %s157_s21 }
  0x2b   : > { %s395_s22 = smul.u32 (!%p152_p13), 24, %s157_s21 }
  0x2d   : > { %s161_s24 = scalar_lea.vmem (!%p152_p13), [#allocation4], %s395_s22 }
  0x31   : > { %525 = dma.done.wait (%p609_p7), %s158_s23, 384  }
  0x32   : > { %527 = vsyncadd (%p609_p7), %s158_s23, 4294966912  ;;  %p185_p10 = scmp.lt.s32.totalorder %s542_s12, 1  ;;  %v553_v0 = vmov 0   ;;  %vm201_vm0 = vcmask 7168   ;;  %v554_v2 = vmov 0.0   ;;  %v194_v3 = vld [vmem:[%s161_s24] sm:$0xff]  ;;  %v205_v15 = vlaneseq }
  0x33   : > { %453 = vset.pattern.permute.xlu0 %v553_v0  ;;  %202 = vst.msk [vmem:[#allocation2] sm:$0xff] %vm201_vm0, %v554_v2  ;;  %203 = vst.msk [vmem:[#allocation3] sm:$0xff] %vm201_vm0, %v554_v2  ;;  %v195_v4 = vld [vmem:[%s161_s24 + $0x8] sm:$0xff]  ;;  %v196_v5 = vld [vmem:[%s161_s24 + $0x10] sm:$0xff]  ;;  %v231_v6 = vmul.f32 64.0, %v194_v3  ;;  %vm223_vm1 = vcmask 359424  }
  0x34   : > { %s719_s12 = smov (!%p185_p10, %s542_s12), 1  ;;  %v232_v7 = vmul.f32 64.0, %v195_v4  ;;  %v233_v8 = vmul.f32 64.0, %v196_v5  ;;  %v206_v16 = vand.u32 127, %v205_v15 }
  0x35   : > { %s385_s25 = sshll.u32 %s719_s12, 3  ;;  %v387_v9 = vadd.f32 -64.0, %v231_v6 }
  0x36   : > { %s188_s28 = scalar_lea.vmem %s704_s0, %s385_s25  ;;  %v388_v10 = vadd.f32 -64.0, %v232_v7  ;;  %v389_v11 = vadd.f32 -64.0, %v233_v8  ;;  %v207_v18 = vadd.s32 128, %v206_v16  ;;  %v208_v19 = vadd.s32 256, %v206_v16  ;;  %s193_s30 = scalar_lea.vmem %s706_s2, %s385_s25 }
  0x37   : > { %v204_v1 = vld [vmem:[%s188_s28] sm:$0xff]  ;;  %v237_v12 = vmul.f32 1.442695, %v387_v9 }
  0x38   : > { %213 = vperm.xlu0 %453, %v204_v1   ;;  %v239_v13 = vmul.f32 1.442695, %v388_v10  ;;  %v241_v14 = vmul.f32 1.442695, %v389_v11 }
  0x39   : > { %454 = vpow2.f32 %v237_v12 }
  0x3a   : > { %456 = vpow2.f32 %v239_v13  ;;  %v243_v35 = vld [vmem:[#allocation2] sm:$0xff]  ;;  %v218_v36 = vld [vmem:[#allocation3] sm:$0xff] }
  0x3b   : > { %458 = vpow2.f32 %v241_v14 }
  0x43   : > { %v455_v17 = vpop.eup %454 }
  0x44   : > { %v457_v20 = vpop.eup %456 }
  0x45   : > { %v459_v21 = vpop.eup %458 }
  0xb7   : > { %v214_v22 = vpop.permute.xlu0 %213 }
  0xb8   : > { %vm215_vm2 = vcmp.eq.s32.totalorder %v206_v16, %v214_v22  ;;  %vm216_vm3 = vcmp.eq.s32.totalorder %v207_v18, %v214_v22  ;;  %vm217_vm4 = vcmp.eq.s32.totalorder %v208_v19, %v214_v22 }
  0xb9   : > { %v244_v23 = vsel %vm215_vm2, 0.0, %v455_v17  ;;  %v245_v24 = vsel %vm216_vm3, 0.0, %v457_v20  ;;  %v246_v25 = vsel %vm217_vm4, 0.0, %v459_v21  ;;  %v219_v26 = vsel %vm215_vm2, %v194_v3, 0.0 }
  0xba   : > { %v247_v27 = vadd.f32 %v245_v24, %v244_v23  ;;  %v248_v28 = vsel %vm223_vm1, %v246_v25, 0.0  ;;  %v220_v29 = vsel %vm216_vm3, %v195_v4, 0.0  ;;  %v221_v30 = vsel %vm217_vm4, %v196_v5, 0.0 }
  0xbb   : > { %v222_v31 = vadd.f32 %v220_v29, %v219_v26  ;;  %v224_v32 = vsel %vm223_vm1, %v221_v30, 0.0 }
  0xbc   : > { %v249_v33 = vadd.f32 %v248_v28, %v247_v27 }
  0xbd   : > { %v225_v34 = vadd.f32 %v224_v32, %v222_v31 }
  0xbe   : > { %250 = vadd.xlane.f32.xlu1 %v249_v33 }
  0xbf   : > { %226 = vadd.xlane.f32.xlu0 %v225_v34 }
 0x14b   : > { %v251_v37 = vpop.xlane.xlu1 %250 }
 0x14c   : > { %v252_v38 = vadd.f32 %v251_v37, %v243_v35  ;;  %v227_v39 = vpop.xlane.xlu0 %226 }
 0x14d   : > { %v228_v40 = vadd.f32 %v227_v39, %v218_v36 }
 0x14e   : > { %253 = vst.msk [vmem:[#allocation2] sm:$0xff] %vm201_vm0, %v252_v38 }
 0x14f   : > { %230 = vst.msk [vmem:[#allocation3] sm:$0xff] %vm201_vm0, %v228_v40 }
 0x155   : > { %v274_v46 = vld [vmem:[#allocation2] sm:$0xff] }
 0x156   : > { %v257_v41 = vld [vmem:[#allocation3] sm:$0xff] }
 0x157   : > { %v390_v42 = vclamps-f32 %v257_v41, 0.9999999 }
 0x159   : > { %v260_v43 = vmul.f32 %v390_v42, %v390_v42  ;;  %v270_v54 = vmul.f32 0.87758255, %v390_v42 }
 0x15b   : > { %v261_v44 = vsub.f32 1.0, %v260_v43 }
 0x15d   : > { %v262_v45 = vmax.f32 %v261_v44, 0.0 }
 0x15f   : > { %460 = vrsqrt.f32 %v262_v45  ;;  %vm265_vm5 = vcmp.eq.f32.partialorder %v262_v45, inf  ;;  %v268_v50 = vand.u32 2147483648, %v262_v45  ;;  %vm267_vm6 = vcmp.eq.f32.partialorder %v262_v45, 0.0 }
 0x160   : > { %462 = vlog2.f32 %v274_v46 }
 0x169   : > { %v461_v47 = vpop.eup %460 }
 0x16a   : > { %v264_v48 = vmul.f32 %v461_v47, %v262_v45  ;;  %v463_v49 = vpop.eup %462 }
 0x16b   : > { %v276_v53 = vmul.f32 0.6931472, %v463_v49 }
 0x16c   : > { %v266_v51 = vsel %vm265_vm5, %v262_v45, %v264_v48 }
 0x16d   : > { %v269_v52 = vsel %vm267_vm6, %v268_v50, %v266_v51  ;;  %v277_v57 = vadd.f32 64.0, %v276_v53 }
 0x16e   : > { %v271_v55 = vmul.f32 0.47942555, %v269_v52 }
 0x170   : > { %v272_v56 = vsub.f32 %v270_v54, %v271_v55 }
 0x172   : > { %v273_v58 = vmul.f32 64.0, %v272_v56 }
 0x174   : > { %v278_v59 = vmax.f32 %v273_v58, %v277_v57 }
 0x176   : > { %v279_v60 = vsub.f32 %v273_v58, %v278_v59  ;;  %v282_v61 = vsub.f32 %v277_v57, %v278_v59 }
 0x178   : > { %v280_v62 = vmul.f32 1.442695, %v279_v60  ;;  %v283_v63 = vmul.f32 1.442695, %v282_v61 }
 0x17a   : > { %464 = vpow2.f32 %v280_v62 }
 0x17b   : > { %466 = vpow2.f32 %v283_v63 }
 0x184   : > { %v465_v0 = vpop.eup %464 }
 0x185   : > { %v467_v1 = vpop.eup %466 }
 0x186   : > { %v285_v2 = vadd.f32 %v467_v1, %v465_v0 }
 0x188   : > { %468 = vlog2.f32 %v285_v2 }
 0x192   : > { %v469_v3 = vpop.eup %468 }
 0x193   : > { %v287_v4 = vmul.f32 0.6931472, %v469_v3 }
 0x195   : > { %v288_v5 = vadd.f32 %v287_v4, %v278_v59 }
 0x197   : > { %v289_v6 = vsub.f32 %v273_v58, %v288_v5 }
 0x199   : > { %290 = vst.msk [vmem:[%s193_s30] sm:$0xff] %vm201_vm0, %v289_v6 }
 0x19a PF: > { %s15_s14 = sadd.s32 1, %s550_s14   ;;  %s711_s9 = smov %s534_s10 }
 0x19b   : > { %p12_p7 = scmp.ge.s32.totalorder %s15_s14, 4   ;;  %s712_s10 = smov %s538_s11 }
 0x19c   : > { %s713_s11 = smov %s615_s20  ;;  %s714_s12 = smov %s546_s13 }
 0x19d   : > { %s715_s13 = smov %s717_s16  ;;  %14 = sbr.rel (!%p12_p7) target bundleno = 4 (0x4), region = 79 }
 0x1a4   :  { %310 = vsyncpa [#allocation5], 1 }
 0x1a5   :  { %312 = vsyncpa [#allocation5 + $0x1], 1 }

</bundles_post_ra>
